<compile_context>
chip_gen: v7x
topology: tpu7x:2x2x1
jax: 0.10.0
libtpu: 0.0.40
codegen_flags: <defaults>
</compile_context>

<pallas_src>
import functools
import numpy as np

import jax
import jax.numpy as jnp
from jax.experimental import pallas as pl
from jax.experimental.pallas import tpu as pltpu

# SH constants (identical to the PyTorch module).
C0 = 0.28209479177387814
C1 = 0.4886025119029199
C2 = [1.0925484305920792, -1.0925484305920792, 0.31539156525252005,
      -1.0925484305920792, 0.5462742152960396]
C3 = [-0.5900435899266435, 2.890611442640554, -0.4570457994644658,
      0.3731763325901154, -0.4570457994644658, 1.445305721320277,
      -0.5900435899266435]
C4 = [2.5033429417967046, -1.7701307697799304, 0.9461746957575601,
      -0.6690465435572892, 0.10578554691520431, -0.6690465435572892,
      0.47308734787878004, -1.7701307697799304, 0.6258357354491761]

_LANE = 128
_ROW_CHUNK = 16   # sublane rows per inner chunk (2 vregs per f32 temporary)


def _round_up(v, m):
    return ((v + m - 1) // m) * m


def _cdiv(a, b):
    return -(-a // b)


def _sh_kernel(xyz_ref, out_ref, *, degree, row_chunk):
    """SH basis for one block of points.

    xyz_ref : (3, R, 128)          x / y / z on leading axis, points on (R, 128)
    out_ref : (degree**2, R, 128)  SH components on leading axis
    """
    odt = out_ref.dtype
    n_chunks = out_ref.shape[1] // row_chunk

    # Process the (R, 128) tile in 16-row sublane chunks so the ~16 f32
    # temporaries fit in the 64-vreg register file (no VMEM spills).
    @pl.loop(0, n_chunks)
    def _(c):
        r0 = pl.multiple_of(c * row_chunk, row_chunk)
        rows = pl.ds(r0, row_chunk)

        # Compute in f32 for accuracy (and to avoid emulated bf16 VPU on v5e).
        x = xyz_ref[0, rows, :].astype(jnp.float32)   # (row_chunk, 128)
        y = xyz_ref[1, rows, :].astype(jnp.float32)
        z = xyz_ref[2, rows, :].astype(jnp.float32)

        def st(idx, val):
            out_ref[idx, rows, :] = val.astype(odt)

        # TODO(synk): on v5e, the constant l=0 component could be dropped and
        # folded into the consumer as a bias column to save one store/subtile.
        st(0, jnp.full_like(x, C0))

        if degree > 1:
            st(1, -C1 * y)
            st(2, C1 * z)
            st(3, -C1 * x)
        if degree > 2:
            xx, yy, zz = x * x, y * y, z * z
            xy, yz, xz = x * y, y * z, x * z
            xx_yy = xx - yy
            sxy = xx + yy                       # shared by comps 6, 11, 12, 13
            st(4, C2[0] * xy)
            st(5, C2[1] * yz)
            st(6, C2[2] * (2.0 * zz - sxy))
            st(7, C2[3] * xz)
            st(8, C2[4] * xx_yy)
        if degree > 3:
            t3xx_yy = 3.0 * xx - yy
            xx_3yy = xx - 3.0 * yy
            t4zz = 4.0 * zz - sxy
            st(9,  C3[0] * y * t3xx_yy)
            st(10, C3[1] * xy * z)
            st(11, C3[2] * y * t4zz)
            st(12, C3[3] * z * (2.0 * zz - 3.0 * sxy))
            st(13, C3[4] * x * t4zz)
            st(14, C3[5] * z * xx_yy)
            st(15, C3[6] * x * xx_3yy)
        if degree > 4:
            t7zz_1 = 7.0 * zz - 1.0
            t7zz_3 = 7.0 * zz - 3.0
            st(16, C4[0] * xy * xx_yy)
            st(17, C4[1] * yz * t3xx_yy)
            st(18, C4[2] * xy * t7zz_1)
            st(19, C4[3] * yz * t7zz_3)
            st(20, C4[4] * (zz * (35.0 * zz - 30.0) + 3.0))
            st(21, C4[5] * xz * t7zz_3)
            st(22, C4[6] * xx_yy * t7zz_1)
            st(23, C4[7] * xz * xx_3yy)
            st(24, C4[8] * (xx * xx_3yy - yy * t3xx_yy))


def _grid_shape(n_rows, max_rows_per_block):
    """Even number of grid steps (>=2) so 'parallel' shards across v7x's 2 TCs."""
    num_steps = max(2, _cdiv(max(n_rows, 1), max_rows_per_block))
    num_steps = _round_up(num_steps, 2)
    row_block = _round_up(_cdiv(max(n_rows, 1), num_steps), _ROW_CHUNK)
    return num_steps, row_block


def _sh_encode_soa(soa, degree, out_dtype, max_rows_per_block):
    """Core: SoA coords (3, N) -> SH slab (degree**2, N). No transposes."""
    assert soa.ndim == 2 and soa.shape[0] == 3
    assert 1 <= degree <= 5
    out_dim = degree ** 2
    out_dtype = jnp.dtype(soa.dtype if out_dtype is None else out_dtype)

    n = soa.shape[1]
    n_rows = _cdiv(max(n, 1), _LANE)
    num_steps, row_block = _grid_shape(n_rows, max_rows_per_block)
    n_rows_pad = num_steps * row_block
    n_pad = n_rows_pad * _LANE

    if n_pad != n:
        # Pad the already-transposed SoA view (single fusible copy); padded
        # points are zeros and are sliced off below.
        soa = jnp.pad(soa, ((0, 0), (0, n_pad - n)))
    coords = soa.reshape(3, n_rows_pad, _LANE)

    kernel = functools.partial(_sh_kernel, degree=degree,
                               row_chunk=min(_ROW_CHUNK, row_block))
    cost = pl.CostEstimate(
        flops=(6 + 4 * out_dim) * n_pad,
        transcendentals=0,
        bytes_accessed=n_pad * (3 * coords.dtype.itemsize
                                + out_dim * out_dtype.itemsize))

    out_slab = pl.pallas_call(
        kernel,
        out_shape=jax.ShapeDtypeStruct((out_dim, n_rows_pad, _LANE), out_dtype),
        grid=(num_steps,),
        in_specs=[pl.BlockSpec((3, row_block, _LANE), lambda i: (0, i, 0))],
        out_specs=pl.BlockSpec((out_dim, row_block, _LANE), lambda i: (0, i, 0)),
        compiler_params=pltpu.CompilerParams(
            dimension_semantics=("parallel",)),
        cost_estimate=cost,
    )(coords)

    slab = out_slab.reshape(out_dim, n_pad)
    if n_pad != n:
        slab = slab[:, :n]
    return slab


def sh_encode_slab(inp, degree=4, *, out_dtype=None, coords_are_soa=False,
                   max_rows_per_block=1024):
    """Hot-path entry: returns the (out_dim, N) slab (no output transpose).

    inp: (..., 3) AoS directions, or (3, N) SoA if coords_are_soa=True
         (the SoA path also skips the input transpose).
    out_dtype: dtype to emit from the kernel (e.g. jnp.bfloat16 for a bf16
         consumer); defaults to inp.dtype.
    """
    if coords_are_soa:
        soa = inp
    else:
        assert inp.shape[-1] == 3
        soa = inp.reshape(-1, 3).T
    return _sh_encode_soa(soa, degree, out_dtype, max_rows_per_block)


def sh_encode(inp, degree=4, *, out_dtype=None, max_rows_per_block=1024):
    """Matches SHEncoder.forward exactly: (..., 3) -> (..., degree**2).

    Note: this layout requires one (out_dim, N) -> (N, out_dim) XLA transpose
    after the kernel.  On the hot path prefer sh_encode_slab and fuse that
    transpose into the consumer's first matmul dot(W[H, out_dim], SH[out_dim, N]).
    """
    assert inp.shape[-1] == 3
    assert 1 <= degree <= 5
    batch_shape = inp.shape[:-1]
    out_dim = degree ** 2
    slab = sh_encode_slab(inp, degree, out_dtype=out_dtype,
                          max_rows_per_block=max_rows_per_block)
    return slab.T.reshape(*batch_shape, out_dim)


def _sh_reference(inp, degree=4):
    """Pure-JAX reference mirroring the PyTorch forward (for validation)."""
    x, y, z = inp[..., 0], inp[..., 1], inp[..., 2]
    xx, yy, zz = x * x, y * y, z * z
    xy, yz, xz = x * y, y * z, x * z
    comps = [jnp.full_like(x, C0)]
    if degree > 1:
        comps += [-C1 * y, C1 * z, -C1 * x]
    if degree > 2:
        comps += [C2[0] * xy, C2[1] * yz, C2[2] * (2.0 * zz - xx - yy),
                  C2[3] * xz, C2[4] * (xx - yy)]
    if degree > 3:
        comps += [C3[0] * y * (3 * xx - yy), C3[1] * xy * z,
                  C3[2] * y * (4 * zz - xx - yy),
                  C3[3] * z * (2 * zz - 3 * xx - 3 * yy),
                  C3[4] * x * (4 * zz - xx - yy),
                  C3[5] * z * (xx - yy), C3[6] * x * (xx - 3 * yy)]
    if degree > 4:
        comps += [C4[0] * xy * (xx - yy), C4[1] * yz * (3 * xx - yy),
                  C4[2] * xy * (7 * zz - 1), C4[3] * yz * (7 * zz - 3),
                  C4[4] * (zz * (35 * zz - 30) + 3), C4[5] * xz * (7 * zz - 3),
                  C4[6] * (xx - yy) * (7 * zz - 1), C4[7] * xz * (xx - 3 * yy),
                  C4[8] * (xx * (xx - 3 * yy) - yy * (3 * xx - yy))]
    return jnp.stack(comps, axis=-1)


if __name__ == "__main__":
    key = jax.random.PRNGKey(0)
    # Small shape consistent with the module: a batch of directions (..., 3).
    batch, seq = 2, 8
    dirs = jax.random.normal(key, (batch, seq, 3), dtype=jnp.float32)
    dirs = dirs / jnp.linalg.norm(dirs, axis=-1, keepdims=True)

    ref = _sh_reference(dirs, degree=4)

    # Spec-compatible path (same layout/dtype as the PyTorch module).
    out = jax.block_until_ready(sh_encode(dirs, degree=4))
    assert out.shape == (batch, seq, 16)
    np.testing.assert_allclose(np.asarray(out), np.asarray(ref),
                               rtol=1e-5, atol=1e-5)

    # Hot-path variant: (out_dim, N) slab, bf16 output, no output transpose.
    slab = jax.block_until_ready(
        sh_encode_slab(dirs, degree=4, out_dtype=jnp.bfloat16))
    assert slab.shape == (16, batch * seq) and slab.dtype == jnp.bfloat16
    np.testing.assert_allclose(np.asarray(slab, dtype=np.float32),
                               np.asarray(ref.reshape(-1, 16).T),
                               rtol=2e-2, atol=2e-2)

    print("KERNEL_OK")
</pallas_src>

<mosaic_0001>
module attributes {stable_mosaic.version = 11 : i64} {
  func.func @_sh_kernel(%arg0: i32, %arg1: memref<3x16x128xf32, #tpu.memory_space<vmem>>, %arg2: memref<16x16x128xf32, #tpu.memory_space<vmem>>) attributes {dimension_semantics = [#tpu.dimension_semantics<parallel>], iteration_bounds = array<i64: 2>, scalar_prefetch = 0 : i64, scratch_operands = 0 : i64, tpu.core_type = #tpu.core_type<tc>, window_params = [{transform_indices = @transform_0, window_bounds = array<i64: 3, 16, 128>}, {transform_indices = @transform_1, window_bounds = array<i64: 16, 16, 128>}]} {
    %c0_i32 = arith.constant 0 : i32
    %c1_i32 = arith.constant 1 : i32
    %0 = arith.muli %c0_i32, %c1_i32 : i32
    %c0_i32_0 = arith.constant 0 : i32
    %1 = arith.addi %c0_i32_0, %0 : i32
    %c16_i32 = arith.constant 16 : i32
    %2 = arith.muli %1, %c16_i32 : i32
    %3 = tpu.assume_multiple %2, 16 : i32
    %c0 = arith.constant 0 : index
    %4 = arith.index_cast %3 : i32 to index
    %c0_1 = arith.constant 0 : index
    %5 = vector.load %arg1[%c0, %4, %c0_1] : memref<3x16x128xf32, #tpu.memory_space<vmem>>, vector<1x16x128xf32>
    %6 = vector.shape_cast %5 : vector<1x16x128xf32> to vector<16x128xf32>
    %c1 = arith.constant 1 : index
    %7 = arith.index_cast %3 : i32 to index
    %c0_2 = arith.constant 0 : index
    %8 = vector.load %arg1[%c1, %7, %c0_2] : memref<3x16x128xf32, #tpu.memory_space<vmem>>, vector<1x16x128xf32>
    %9 = vector.shape_cast %8 : vector<1x16x128xf32> to vector<16x128xf32>
    %c2 = arith.constant 2 : index
    %10 = arith.index_cast %3 : i32 to index
    %c0_3 = arith.constant 0 : index
    %11 = vector.load %arg1[%c2, %10, %c0_3] : memref<3x16x128xf32, #tpu.memory_space<vmem>>, vector<1x16x128xf32>
    %12 = vector.shape_cast %11 : vector<1x16x128xf32> to vector<16x128xf32>
    %cst = arith.constant 0.282094806 : f32
    %13 = vector.broadcast %cst : f32 to vector<16x128xf32>
    %c0_4 = arith.constant 0 : index
    %14 = arith.index_cast %3 : i32 to index
    %c0_5 = arith.constant 0 : index
    %15 = vector.load %arg2[%c0_4, %14, %c0_5] : memref<16x16x128xf32, #tpu.memory_space<vmem>>, vector<1x16x128xf32>
    %16 = vector.shape_cast %15 : vector<1x16x128xf32> to vector<16x128xf32>
    %17 = vector.shape_cast %13 : vector<16x128xf32> to vector<1x16x128xf32>
    tpu.vector_store %arg2[%c0_4, %14, %c0_5], %17 {strides = array<i32>} : memref<16x16x128xf32, #tpu.memory_space<vmem>>, vector<1x16x128xf32>,
    %cst_6 = arith.constant -0.488602519 : f32
    %18 = vector.broadcast %cst_6 : f32 to vector<16x128xf32>
    %19 = arith.mulf %18, %9 : vector<16x128xf32>
    %c1_7 = arith.constant 1 : index
    %20 = arith.index_cast %3 : i32 to index
    %c0_8 = arith.constant 0 : index
    %21 = vector.load %arg2[%c1_7, %20, %c0_8] : memref<16x16x128xf32, #tpu.memory_space<vmem>>, vector<1x16x128xf32>
    %22 = vector.shape_cast %21 : vector<1x16x128xf32> to vector<16x128xf32>
    %23 = vector.shape_cast %19 : vector<16x128xf32> to vector<1x16x128xf32>
    tpu.vector_store %arg2[%c1_7, %20, %c0_8], %23 {strides = array<i32>} : memref<16x16x128xf32, #tpu.memory_space<vmem>>, vector<1x16x128xf32>,
    %cst_9 = arith.constant 0.488602519 : f32
    %24 = vector.broadcast %cst_9 : f32 to vector<16x128xf32>
    %25 = arith.mulf %24, %12 : vector<16x128xf32>
    %c2_10 = arith.constant 2 : index
    %26 = arith.index_cast %3 : i32 to index
    %c0_11 = arith.constant 0 : index
    %27 = vector.load %arg2[%c2_10, %26, %c0_11] : memref<16x16x128xf32, #tpu.memory_space<vmem>>, vector<1x16x128xf32>
    %28 = vector.shape_cast %27 : vector<1x16x128xf32> to vector<16x128xf32>
    %29 = vector.shape_cast %25 : vector<16x128xf32> to vector<1x16x128xf32>
    tpu.vector_store %arg2[%c2_10, %26, %c0_11], %29 {strides = array<i32>} : memref<16x16x128xf32, #tpu.memory_space<vmem>>, vector<1x16x128xf32>,
    %cst_12 = arith.constant -0.488602519 : f32
    %30 = vector.broadcast %cst_12 : f32 to vector<16x128xf32>
    %31 = arith.mulf %30, %6 : vector<16x128xf32>
    %c3 = arith.constant 3 : index
    %32 = arith.index_cast %3 : i32 to index
    %c0_13 = arith.constant 0 : index
    %33 = vector.load %arg2[%c3, %32, %c0_13] : memref<16x16x128xf32, #tpu.memory_space<vmem>>, vector<1x16x128xf32>
    %34 = vector.shape_cast %33 : vector<1x16x128xf32> to vector<16x128xf32>
    %35 = vector.shape_cast %31 : vector<16x128xf32> to vector<1x16x128xf32>
    tpu.vector_store %arg2[%c3, %32, %c0_13], %35 {strides = array<i32>} : memref<16x16x128xf32, #tpu.memory_space<vmem>>, vector<1x16x128xf32>,
    %36 = arith.mulf %6, %6 : vector<16x128xf32>
    %37 = arith.mulf %9, %9 : vector<16x128xf32>
    %38 = arith.mulf %12, %12 : vector<16x128xf32>
    %39 = arith.mulf %6, %9 : vector<16x128xf32>
    %40 = arith.mulf %9, %12 : vector<16x128xf32>
    %41 = arith.mulf %6, %12 : vector<16x128xf32>
    %42 = arith.subf %36, %37 : vector<16x128xf32>
    %43 = arith.addf %36, %37 : vector<16x128xf32>
    %cst_14 = arith.constant 1.09254849 : f32
    %44 = vector.broadcast %cst_14 : f32 to vector<16x128xf32>
    %45 = arith.mulf %44, %39 : vector<16x128xf32>
    %c4 = arith.constant 4 : index
    %46 = arith.index_cast %3 : i32 to index
    %c0_15 = arith.constant 0 : index
    %47 = vector.load %arg2[%c4, %46, %c0_15] : memref<16x16x128xf32, #tpu.memory_space<vmem>>, vector<1x16x128xf32>
    %48 = vector.shape_cast %47 : vector<1x16x128xf32> to vector<16x128xf32>
    %49 = vector.shape_cast %45 : vector<16x128xf32> to vector<1x16x128xf32>
    tpu.vector_store %arg2[%c4, %46, %c0_15], %49 {strides = array<i32>} : memref<16x16x128xf32, #tpu.memory_space<vmem>>, vector<1x16x128xf32>,
    %cst_16 = arith.constant -1.09254849 : f32
    %50 = vector.broadcast %cst_16 : f32 to vector<16x128xf32>
    %51 = arith.mulf %50, %40 : vector<16x128xf32>
    %c5 = arith.constant 5 : index
    %52 = arith.index_cast %3 : i32 to index
    %c0_17 = arith.constant 0 : index
    %53 = vector.load %arg2[%c5, %52, %c0_17] : memref<16x16x128xf32, #tpu.memory_space<vmem>>, vector<1x16x128xf32>
    %54 = vector.shape_cast %53 : vector<1x16x128xf32> to vector<16x128xf32>
    %55 = vector.shape_cast %51 : vector<16x128xf32> to vector<1x16x128xf32>
    tpu.vector_store %arg2[%c5, %52, %c0_17], %55 {strides = array<i32>} : memref<16x16x128xf32, #tpu.memory_space<vmem>>, vector<1x16x128xf32>,
    %cst_18 = arith.constant 2.000000e+00 : f32
    %56 = vector.broadcast %cst_18 : f32 to vector<16x128xf32>
    %57 = arith.mulf %56, %38 : vector<16x128xf32>
    %58 = arith.subf %57, %43 : vector<16x128xf32>
    %cst_19 = arith.constant 0.31539157 : f32
    %59 = vector.broadcast %cst_19 : f32 to vector<16x128xf32>
    %60 = arith.mulf %59, %58 : vector<16x128xf32>
    %c6 = arith.constant 6 : index
    %61 = arith.index_cast %3 : i32 to index
    %c0_20 = arith.constant 0 : index
    %62 = vector.load %arg2[%c6, %61, %c0_20] : memref<16x16x128xf32, #tpu.memory_space<vmem>>, vector<1x16x128xf32>
    %63 = vector.shape_cast %62 : vector<1x16x128xf32> to vector<16x128xf32>
    %64 = vector.shape_cast %60 : vector<16x128xf32> to vector<1x16x128xf32>
    tpu.vector_store %arg2[%c6, %61, %c0_20], %64 {strides = array<i32>} : memref<16x16x128xf32, #tpu.memory_space<vmem>>, vector<1x16x128xf32>,
    %cst_21 = arith.constant -1.09254849 : f32
    %65 = vector.broadcast %cst_21 : f32 to vector<16x128xf32>
    %66 = arith.mulf %65, %41 : vector<16x128xf32>
    %c7 = arith.constant 7 : index
    %67 = arith.index_cast %3 : i32 to index
    %c0_22 = arith.constant 0 : index
    %68 = vector.load %arg2[%c7, %67, %c0_22] : memref<16x16x128xf32, #tpu.memory_space<vmem>>, vector<1x16x128xf32>
    %69 = vector.shape_cast %68 : vector<1x16x128xf32> to vector<16x128xf32>
    %70 = vector.shape_cast %66 : vector<16x128xf32> to vector<1x16x128xf32>
    tpu.vector_store %arg2[%c7, %67, %c0_22], %70 {strides = array<i32>} : memref<16x16x128xf32, #tpu.memory_space<vmem>>, vector<1x16x128xf32>,
    %cst_23 = arith.constant 0.546274245 : f32
    %71 = vector.broadcast %cst_23 : f32 to vector<16x128xf32>
    %72 = arith.mulf %71, %42 : vector<16x128xf32>
    %c8 = arith.constant 8 : index
    %73 = arith.index_cast %3 : i32 to index
    %c0_24 = arith.constant 0 : index
    %74 = vector.load %arg2[%c8, %73, %c0_24] : memref<16x16x128xf32, #tpu.memory_space<vmem>>, vector<1x16x128xf32>
    %75 = vector.shape_cast %74 : vector<1x16x128xf32> to vector<16x128xf32>
    %76 = vector.shape_cast %72 : vector<16x128xf32> to vector<1x16x128xf32>
    tpu.vector_store %arg2[%c8, %73, %c0_24], %76 {strides = array<i32>} : memref<16x16x128xf32, #tpu.memory_space<vmem>>, vector<1x16x128xf32>,
    %cst_25 = arith.constant 3.000000e+00 : f32
    %77 = vector.broadcast %cst_25 : f32 to vector<16x128xf32>
    %78 = arith.mulf %77, %36 : vector<16x128xf32>
    %79 = arith.subf %78, %37 : vector<16x128xf32>
    %cst_26 = arith.constant 3.000000e+00 : f32
    %80 = vector.broadcast %cst_26 : f32 to vector<16x128xf32>
    %81 = arith.mulf %80, %37 : vector<16x128xf32>
    %82 = arith.subf %36, %81 : vector<16x128xf32>
    %cst_27 = arith.constant 4.000000e+00 : f32
    %83 = vector.broadcast %cst_27 : f32 to vector<16x128xf32>
    %84 = arith.mulf %83, %38 : vector<16x128xf32>
    %85 = arith.subf %84, %43 : vector<16x128xf32>
    %cst_28 = arith.constant -0.590043604 : f32
    %86 = vector.broadcast %cst_28 : f32 to vector<16x128xf32>
    %87 = arith.mulf %86, %9 : vector<16x128xf32>
    %88 = arith.mulf %87, %79 : vector<16x128xf32>
    %c9 = arith.constant 9 : index
    %89 = arith.index_cast %3 : i32 to index
    %c0_29 = arith.constant 0 : index
    %90 = vector.load %arg2[%c9, %89, %c0_29] : memref<16x16x128xf32, #tpu.memory_space<vmem>>, vector<1x16x128xf32>
    %91 = vector.shape_cast %90 : vector<1x16x128xf32> to vector<16x128xf32>
    %92 = vector.shape_cast %88 : vector<16x128xf32> to vector<1x16x128xf32>
    tpu.vector_store %arg2[%c9, %89, %c0_29], %92 {strides = array<i32>} : memref<16x16x128xf32, #tpu.memory_space<vmem>>, vector<1x16x128xf32>,
    %cst_30 = arith.constant 2.89061141 : f32
    %93 = vector.broadcast %cst_30 : f32 to vector<16x128xf32>
    %94 = arith.mulf %93, %39 : vector<16x128xf32>
    %95 = arith.mulf %94, %12 : vector<16x128xf32>
    %c10 = arith.constant 10 : index
    %96 = arith.index_cast %3 : i32 to index
    %c0_31 = arith.constant 0 : index
    %97 = vector.load %arg2[%c10, %96, %c0_31] : memref<16x16x128xf32, #tpu.memory_space<vmem>>, vector<1x16x128xf32>
    %98 = vector.shape_cast %97 : vector<1x16x128xf32> to vector<16x128xf32>
    %99 = vector.shape_cast %95 : vector<16x128xf32> to vector<1x16x128xf32>
    tpu.vector_store %arg2[%c10, %96, %c0_31], %99 {strides = array<i32>} : memref<16x16x128xf32, #tpu.memory_space<vmem>>, vector<1x16x128xf32>,
    %cst_32 = arith.constant -0.457045794 : f32
    %100 = vector.broadcast %cst_32 : f32 to vector<16x128xf32>
    %101 = arith.mulf %100, %9 : vector<16x128xf32>
    %102 = arith.mulf %101, %85 : vector<16x128xf32>
    %c11 = arith.constant 11 : index
    %103 = arith.index_cast %3 : i32 to index
    %c0_33 = arith.constant 0 : index
    %104 = vector.load %arg2[%c11, %103, %c0_33] : memref<16x16x128xf32, #tpu.memory_space<vmem>>, vector<1x16x128xf32>
    %105 = vector.shape_cast %104 : vector<1x16x128xf32> to vector<16x128xf32>
    %106 = vector.shape_cast %102 : vector<16x128xf32> to vector<1x16x128xf32>
    tpu.vector_store %arg2[%c11, %103, %c0_33], %106 {strides = array<i32>} : memref<16x16x128xf32, #tpu.memory_space<vmem>>, vector<1x16x128xf32>,
    %cst_34 = arith.constant 0.373176336 : f32
    %107 = vector.broadcast %cst_34 : f32 to vector<16x128xf32>
    %108 = arith.mulf %107, %12 : vector<16x128xf32>
    %cst_35 = arith.constant 2.000000e+00 : f32
    %109 = vector.broadcast %cst_35 : f32 to vector<16x128xf32>
    %110 = arith.mulf %109, %38 : vector<16x128xf32>
    %cst_36 = arith.constant 3.000000e+00 : f32
    %111 = vector.broadcast %cst_36 : f32 to vector<16x128xf32>
    %112 = arith.mulf %111, %43 : vector<16x128xf32>
    %113 = arith.subf %110, %112 : vector<16x128xf32>
    %114 = arith.mulf %108, %113 : vector<16x128xf32>
    %c12 = arith.constant 12 : index
    %115 = arith.index_cast %3 : i32 to index
    %c0_37 = arith.constant 0 : index
    %116 = vector.load %arg2[%c12, %115, %c0_37] : memref<16x16x128xf32, #tpu.memory_space<vmem>>, vector<1x16x128xf32>
    %117 = vector.shape_cast %116 : vector<1x16x128xf32> to vector<16x128xf32>
    %118 = vector.shape_cast %114 : vector<16x128xf32> to vector<1x16x128xf32>
    tpu.vector_store %arg2[%c12, %115, %c0_37], %118 {strides = array<i32>} : memref<16x16x128xf32, #tpu.memory_space<vmem>>, vector<1x16x128xf32>,
    %cst_38 = arith.constant -0.457045794 : f32
    %119 = vector.broadcast %cst_38 : f32 to vector<16x128xf32>
    %120 = arith.mulf %119, %6 : vector<16x128xf32>
    %121 = arith.mulf %120, %85 : vector<16x128xf32>
    %c13 = arith.constant 13 : index
    %122 = arith.index_cast %3 : i32 to index
    %c0_39 = arith.constant 0 : index
    %123 = vector.load %arg2[%c13, %122, %c0_39] : memref<16x16x128xf32, #tpu.memory_space<vmem>>, vector<1x16x128xf32>
    %124 = vector.shape_cast %123 : vector<1x16x128xf32> to vector<16x128xf32>
    %125 = vector.shape_cast %121 : vector<16x128xf32> to vector<1x16x128xf32>
    tpu.vector_store %arg2[%c13, %122, %c0_39], %125 {strides = array<i32>} : memref<16x16x128xf32, #tpu.memory_space<vmem>>, vector<1x16x128xf32>,
    %cst_40 = arith.constant 1.44530571 : f32
    %126 = vector.broadcast %cst_40 : f32 to vector<16x128xf32>
    %127 = arith.mulf %126, %12 : vector<16x128xf32>
    %128 = arith.mulf %127, %42 : vector<16x128xf32>
    %c14 = arith.constant 14 : index
    %129 = arith.index_cast %3 : i32 to index
    %c0_41 = arith.constant 0 : index
    %130 = vector.load %arg2[%c14, %129, %c0_41] : memref<16x16x128xf32, #tpu.memory_space<vmem>>, vector<1x16x128xf32>
    %131 = vector.shape_cast %130 : vector<1x16x128xf32> to vector<16x128xf32>
    %132 = vector.shape_cast %128 : vector<16x128xf32> to vector<1x16x128xf32>
    tpu.vector_store %arg2[%c14, %129, %c0_41], %132 {strides = array<i32>} : memref<16x16x128xf32, #tpu.memory_space<vmem>>, vector<1x16x128xf32>,
    %cst_42 = arith.constant -0.590043604 : f32
    %133 = vector.broadcast %cst_42 : f32 to vector<16x128xf32>
    %134 = arith.mulf %133, %6 : vector<16x128xf32>
    %135 = arith.mulf %134, %82 : vector<16x128xf32>
    %c15 = arith.constant 15 : index
    %136 = arith.index_cast %3 : i32 to index
    %c0_43 = arith.constant 0 : index
    %137 = vector.load %arg2[%c15, %136, %c0_43] : memref<16x16x128xf32, #tpu.memory_space<vmem>>, vector<1x16x128xf32>
    %138 = vector.shape_cast %137 : vector<1x16x128xf32> to vector<16x128xf32>
    %139 = vector.shape_cast %135 : vector<16x128xf32> to vector<1x16x128xf32>
    tpu.vector_store %arg2[%c15, %136, %c0_43], %139 {strides = array<i32>} : memref<16x16x128xf32, #tpu.memory_space<vmem>>, vector<1x16x128xf32>,
    %c1_i32_44 = arith.constant 1 : i32
    return
  }
  func.func @transform_0(%arg0: i32) -> (i32, i32, i32) {
    %c0_i32 = arith.constant 0 : i32
    %c0_i32_0 = arith.constant 0 : i32
    %c0_i32_1 = arith.constant 0 : i32
    return %c0_i32, %arg0, %c0_i32_0 : i32, i32, i32
  }
  func.func @transform_1(%arg0: i32) -> (i32, i32, i32) {
    %c0_i32 = arith.constant 0 : i32
    %c0_i32_0 = arith.constant 0 : i32
    %c0_i32_1 = arith.constant 0 : i32
    return %c0_i32, %arg0, %c0_i32_0 : i32, i32, i32
  }
}

</mosaic_0001>

<bundles_post_ra>
// kernel: tpu_custom_call.1
= control target key start
LH: loop header
LB: loop body
LE: loop exit
PB: predicated region body
PF: predicated region fallthrough
CT: control target
= control target key end

     0   :  { %6 = vsyncpa [#allocation3], 0  ;;  %s877_s0 = inlined_call_operand.hbm [shape: f32[3,32,128], index: 0, kind: input, shape index: {}]   ;;  %s878_s1 = inlined_call_operand.hbm [shape: f32[16,32,128], index: 1, kind: output, shape index: {}]  }
   0x1   :  { %8 = vsyncpa [#allocation3 + $0x1], 0 }
   0x2   :  { %9 = vsyncpa [#allocation4], 0 }
   0x3   :  { %11 = vsyncpa [#allocation4 + $0x1], 0  ;;  %s629_s6 = smov 0   ;;  %s631_s7 = smov 0  }
   0x4   :  { %s633_s8 = smov 0   ;;  %s635_s9 = smov 0  }
   0x5 LB: > { %s650_s10 = sadd.s32 4294967295, %s603_s9   ;;  %s445_s11 = sadd.s32 4294967294, %s603_s9   ;;  %s603_s9 = sphi %s635_s9, %s886_s9   ;;  %s599_s8 = sphi %s633_s8, %s885_s8   ;;  %s595_s7 = sphi %s631_s7, %s884_s7   ;;  %s591_s6 = sphi %s629_s6, %s883_s6  }
   0x6   : > { %s654_s12 = sadd.s32 1, %s603_s9   ;;  %s24_s13 = sadd.s32 1, %s599_s8 }
   0x7   : > { %s21_s14 = ssub.s32 %s603_s9, %s654_s12  ;;  %p31_p0 = scmp.ne.s32.totalorder %s599_s8, %s595_s7 }
   0x8   : > { %p22_p1 = scmp.eq.s32.totalorder %s21_s14, 0  ;;  %p32_p2 = scmp.eq.s32.totalorder %s603_s9, 0 }
   0x9   : > { %p37_p3 = scmp.ne.s32.totalorder %s595_s7, %s591_s6  ;;  %p38_p4 = scmp.eq.s32.totalorder %s650_s10, 0 }
   0xa   : > { %s666_s15 = scalar_select %p22_p1, %s599_s8, %s24_s13  }
   0xb   : > { %p668_p5 = por %p32_p2, %p31_p0  ;;  %p672_p6 = por %p38_p4, %p37_p3 }
   0xc   : > { %p61_p7 = scmp.eq.s32.totalorder %s650_s10, 1  ;;  %p67_p8 = scmp.eq.s32.totalorder %s445_s11, 1 }
   0xd   : > { %p447_p11 = scmp.ge.s32.totalorder %s603_s9, 2 }
   0xe   : > { %p677_p9 = por %p61_p7, %p31_p0  ;;  %p681_p10 = por %p67_p8, %p37_p3 }
   0xf   : > { %83 = sbr.rel (%p447_p11) target bundleno = 36 (0x24), region = 16 }
  0x16   : > { %s87_s20 = sand.u32 1, %s599_s8   ;;  %s493_s22 = sshll.u32 %s603_s9, 8 }
  0x17   : > { %s495_s21 = smul.u32 48, %s87_s20  ;;  %s605_s23 = smov 512  }
  0x18   : > { %498 = sst [smem:[#allocation7]] (%p668_p5), %s605_s23  ;;  %s97_s27 = scalar_lea.hbm %s877_s0, %s493_s22 }
  0x19   : > { %s497_s24 = scalar_select %p668_p5, [#allocation0], [#allocation10] }
  0x1a   : > { %s91_s29 = scalar_lea.vmem [#allocation2], %s495_s21  ;;  %s606_s2 = smov 256  }
  0x1b   : > { %s102_s28 = sld [smem:[%s497_s24]]   ;;  %s110_s30 = sshll.u32 %s91_s29, 4  ;;  %s111_s30 = int_to_ptr.vmem [resolvable:$true] %s110_s30 }
  0x1c   : > { %499 = sst [smem:[#allocation7 + $0x1]] (%p668_p5), %s606_s2  ;;  %s607_s3 = smov 2  }
  0x1d   : > { %500 = sst [smem:[#allocation7 + $0x2]] (%p668_p5), %s607_s3  ;;  %s608_s4 = smov 128  }
  0x1e   : > { %501 = sst [smem:[#allocation7 + $0x3]] (%p668_p5), %s608_s4  ;;  %s609_s5 = smov 8  }
  0x1f   : > { %502 = sst [smem:[#allocation7 + $0x4]] (%p668_p5), %s608_s4  ;;  %s88_s14 = scalar_lea.sflag [#allocation3], %s87_s20 }
  0x20   : > { %503 = sst [smem:[#allocation7 + $0x5]] (%p668_p5), %s609_s5  ;;  %s610_s21 = smov [#allocation6]  }
  0x21   : > { %s450_s11 = sshll.u32 %s102_s28, 26 }
  0x22   : > { %s451_s13 = sadd.s32 134217728, %s450_s11 }
  0x23   : > { %504 = dma.general (%p668_p5), %s97_s27, 768, %s111_s30, %s88_s14, %s610_s21, [#allocation7], %s451_s13, 0  }
  0x24 PF: > { %p452_p12 = scmp.ge.s32.totalorder %s603_s9, 1  ;;  %p131_p13 = scmp.lt.s32.totalorder %s603_s9, 3 }
  0x26   : > { %p132_p0 = pnand %p452_p12, %p131_p13 }
  0x27   : > { %s712_s22 = sand.u32 (!%p132_p0), 1, %s595_s7  }
  0x28   : > { %135 = sbr.rel (%p132_p0) target bundleno = 84 (0x54), region = 24  ;;  %s138_s24 = scalar_lea.sflag (!%p132_p0), [#allocation3], %s712_s22 }
  0x29   : > { %s496_s23 = smul.u32 (!%p132_p0), 48, %s712_s22 }
  0x2b   : > { %s141_s25 = scalar_lea.vmem (!%p132_p0), [#allocation2], %s496_s23 }
  0x2f   : > { %582 = dma.done.wait (%p672_p6), %s138_s24, 768  }
  0x30   : > { %584 = vsyncadd (%p672_p6), %s138_s24, 4294966528  ;;  %s453_s16 = sshll.u32 %s712_s22, 8  ;;  %v611_v0 = vmov 0.2820948   ;;  %v725_v1 = vld [vmem:[%s141_s25 + $0x10] sm:$0xff]  ;;  %v727_v2 = vld [vmem:[%s141_s25 + $0x18] sm:$0xff] }
  0x31   : > { %s721_s20 = scalar_lea.vmem [#allocation5], %s453_s16  ;;  %v729_v3 = vld [vmem:[%s141_s25 + $0x20] sm:$0xff]  ;;  %v174_v4 = vmul.f32 -0.48860252, %v725_v1  ;;  %v175_v5 = vmul.f32 -0.48860252, %v727_v2  ;;  %v744_v11 = vmul.f32 %v725_v1, %v725_v1  ;;  %v750_v13 = vmul.f32 %v727_v2, %v727_v2 }
  0x32   : > { %172 = vst [vmem:[%s721_s20] sm:$0xff] %v611_v0  ;;  %173 = vst [vmem:[%s721_s20 + $0x8] sm:$0xff] %v611_v0  ;;  %v179_v6 = vmul.f32 0.48860252, %v729_v3  ;;  %v198_v7 = vmul.f32 %v729_v3, %v725_v1  ;;  %v736_v8 = vld [vmem:[%s141_s25 + $0x28] sm:$0xff]  ;;  %v738_v9 = vld [vmem:[%s141_s25] sm:$0xff]  ;;  %v194_v12 = vmul.f32 %v729_v3, %v729_v3  ;;  %s313_s17 = scalar_lea.sflag [#allocation4], %s712_s22 }
  0x33   : > { %v740_v10 = vld [vmem:[%s141_s25 + $0x8] sm:$0xff]  ;;  %v252_v14 = vmul.f32 -0.5900436, %v725_v1  ;;  %458 = vst [vmem:[%s721_s20 + $0x10] sm:$0xff] %v174_v4  ;;  %459 = vst [vmem:[%s721_s20 + $0x18] sm:$0xff] %v175_v5  ;;  %v196_v18 = vmul.f32 %v725_v1, %v738_v9  ;;  %v199_v21 = vmul.f32 %v736_v8, %v727_v2  ;;  %v767_v22 = vmul.f32 %v738_v9, %v738_v9 }
  0x34   : > { %460 = vst [vmem:[%s721_s20 + $0x20] sm:$0xff] %v179_v6  ;;  %v180_v15 = vmul.f32 0.48860252, %v736_v8  ;;  %v184_v16 = vmul.f32 -0.48860252, %v738_v9  ;;  %v197_v19 = vmul.f32 %v727_v2, %v740_v10  ;;  %v772_v24 = vmul.f32 2.0, %v194_v12 }
  0x35   : > { %v185_v17 = vmul.f32 -0.48860252, %v740_v10  ;;  %v212_v20 = vmul.f32 -1.0925485, %v198_v7  ;;  %v206_v23 = vmul.f32 1.0925485, %v196_v18  ;;  %v776_v25 = vmul.f32 %v740_v10, %v740_v10 }
  0x36   : > { %461 = vst [vmem:[%s721_s20 + $0x28] sm:$0xff] %v180_v15  ;;  %462 = vst [vmem:[%s721_s20 + $0x30] sm:$0xff] %v184_v16  ;;  %v195_v26 = vmul.f32 %v736_v8, %v736_v8  ;;  %v207_v27 = vmul.f32 1.0925485, %v197_v19  ;;  %v213_v28 = vmul.f32 -1.0925485, %v199_v21  ;;  %v204_v29 = vadd.f32 %v744_v11, %v767_v22 }
  0x37   : > { %463 = vst [vmem:[%s721_s20 + $0x38] sm:$0xff] %v185_v17  ;;  %466 = vst [vmem:[%s721_s20 + $0x50] sm:$0xff] %v212_v20  ;;  %v200_v30 = vmul.f32 %v729_v3, %v738_v9  ;;  %v205_v31 = vadd.f32 %v750_v13, %v776_v25  ;;  %v201_v33 = vmul.f32 %v736_v8, %v740_v10  ;;  %v240_v38 = vmul.f32 3.0, %v767_v22 }
  0x38   : > { %464 = vst [vmem:[%s721_s20 + $0x40] sm:$0xff] %v206_v23  ;;  %v219_v32 = vmul.f32 2.0, %v195_v26  ;;  %v202_v34 = vsub.f32 %v767_v22, %v744_v11  ;;  %465 = vst [vmem:[%s721_s20 + $0x48] sm:$0xff] %v207_v27  ;;  %v220_v35 = vsub.f32 %v772_v24, %v204_v29  ;;  %v203_v37 = vsub.f32 %v776_v25, %v750_v13 }
  0x39   : > { %467 = vst [vmem:[%s721_s20 + $0x58] sm:$0xff] %v213_v28  ;;  %v228_v36 = vmul.f32 -1.0925485, %v200_v30  ;;  %v229_v40 = vmul.f32 -1.0925485, %v201_v33  ;;  %v241_v42 = vmul.f32 3.0, %v776_v25  ;;  %v242_v45 = vsub.f32 %v240_v38, %v744_v11 }
  0x3a   : > { %v221_v39 = vsub.f32 %v219_v32, %v205_v31  ;;  %v234_v41 = vmul.f32 0.54627424, %v202_v34  ;;  %v222_v43 = vmul.f32 0.31539157, %v220_v35  ;;  %v235_v44 = vmul.f32 0.54627424, %v203_v37 }
  0x3b   : > { %470 = vst [vmem:[%s721_s20 + $0x70] sm:$0xff] %v228_v36  ;;  %v253_v46 = vmul.f32 -0.5900436, %v727_v2  ;;  %471 = vst [vmem:[%s721_s20 + $0x78] sm:$0xff] %v229_v40  ;;  %v243_v48 = vsub.f32 %v241_v42, %v750_v13  ;;  %v260_v49 = vmul.f32 2.8906114, %v196_v18  ;;  %v254_v51 = vmul.f32 %v252_v14, %v242_v45 }
  0x3c   : > { %v223_v47 = vmul.f32 0.31539157, %v221_v39  ;;  %472 = vst [vmem:[%s721_s20 + $0x80] sm:$0xff] %v234_v41  ;;  %v261_v50 = vmul.f32 2.8906114, %v197_v19  ;;  %468 = vst [vmem:[%s721_s20 + $0x60] sm:$0xff] %v222_v43 }
  0x3d   : > { %473 = vst [vmem:[%s721_s20 + $0x88] sm:$0xff] %v235_v44  ;;  %v248_v52 = vmul.f32 4.0, %v194_v12  ;;  %v268_v53 = vmul.f32 -0.4570458, %v725_v1  ;;  %v249_v54 = vmul.f32 4.0, %v195_v26  ;;  %v255_v55 = vmul.f32 %v253_v46, %v243_v48  ;;  %474 = vst [vmem:[%s721_s20 + $0x90] sm:$0xff] %v254_v51 }
  0x3e   : > { %469 = vst [vmem:[%s721_s20 + $0x68] sm:$0xff] %v223_v47  ;;  %v262_v56 = vmul.f32 %v729_v3, %v260_v49  ;;  %v263_v57 = vmul.f32 %v736_v8, %v261_v50  ;;  %v269_v58 = vmul.f32 -0.4570458, %v727_v2  ;;  %v276_v61 = vmul.f32 0.37317634, %v729_v3 }
  0x3f   : > { %v250_v59 = vsub.f32 %v248_v52, %v204_v29  ;;  %v251_v60 = vsub.f32 %v249_v54, %v205_v31  ;;  %v278_v62 = vmul.f32 3.0, %v204_v29  ;;  %475 = vst [vmem:[%s721_s20 + $0x98] sm:$0xff] %v255_v55  ;;  %v277_v63 = vmul.f32 0.37317634, %v736_v8 }
  0x40   : > { %476 = vst [vmem:[%s721_s20 + $0xa0] sm:$0xff] %v262_v56  ;;  %477 = vst [vmem:[%s721_s20 + $0xa8] sm:$0xff] %v263_v57  ;;  %v279_v0 = vmul.f32 3.0, %v205_v31  ;;  %v288_v1 = vmul.f32 -0.4570458, %v738_v9  ;;  %v244_v4 = vmul.f32 3.0, %v744_v11 }
  0x41   : > { %v270_v2 = vmul.f32 %v268_v53, %v250_v59  ;;  %v271_v5 = vmul.f32 %v269_v58, %v251_v60  ;;  %v280_v6 = vsub.f32 %v772_v24, %v278_v62  ;;  %v289_v7 = vmul.f32 -0.4570458, %v740_v10 }
  0x42   : > { %v281_v12 = vsub.f32 %v219_v32, %v279_v0  ;;  %v290_v14 = vmul.f32 %v288_v1, %v250_v59  ;;  %v296_v15 = vmul.f32 1.4453057, %v729_v3  ;;  %v297_v16 = vmul.f32 1.4453057, %v736_v8 }
  0x43   : > { %478 = vst [vmem:[%s721_s20 + $0xb0] sm:$0xff] %v270_v2  ;;  %479 = vst [vmem:[%s721_s20 + $0xb8] sm:$0xff] %v271_v5  ;;  %v282_v11 = vmul.f32 %v280_v6, %v276_v61  ;;  %v291_v17 = vmul.f32 %v289_v7, %v251_v60  ;;  %v246_v18 = vsub.f32 %v767_v22, %v244_v4  ;;  %v304_v19 = vmul.f32 -0.5900436, %v738_v9 }
  0x44   : > { %v283_v20 = vmul.f32 %v281_v12, %v277_v63  ;;  %482 = vst [vmem:[%s721_s20 + $0xd0] sm:$0xff] %v290_v14  ;;  %v298_v21 = vmul.f32 %v296_v15, %v202_v34  ;;  %v299_v3 = vmul.f32 %v297_v16, %v203_v37  ;;  %v245_v8 = vmul.f32 3.0, %v750_v13 }
  0x45   : > { %480 = vst [vmem:[%s721_s20 + $0xc0] sm:$0xff] %v282_v11  ;;  %483 = vst [vmem:[%s721_s20 + $0xd8] sm:$0xff] %v291_v17  ;;  %v306_v23 = vmul.f32 %v304_v19, %v246_v18  ;;  %v305_v24 = vmul.f32 -0.5900436, %v740_v10 }
  0x46   : > { %481 = vst [vmem:[%s721_s20 + $0xc8] sm:$0xff] %v283_v20  ;;  %484 = vst [vmem:[%s721_s20 + $0xe0] sm:$0xff] %v298_v21  ;;  %v247_v22 = vsub.f32 %v776_v25, %v245_v8 }
  0x47   : > { %485 = vst [vmem:[%s721_s20 + $0xe8] sm:$0xff] %v299_v3  ;;  %486 = vst [vmem:[%s721_s20 + $0xf0] sm:$0xff] %v306_v23 }
  0x48   : > { %v307_v9 = vmul.f32 %v305_v24, %v247_v22 }
  0x4a   : > { %487 = vst [vmem:[%s721_s20 + $0xf8] sm:$0xff] %v307_v9 }
  0x4b   : > { %s494_s26 = sshll.u32 %s650_s10, 8  ;;  %s342_s27 = sshll.u32 %s721_s20, 4  ;;  %s343_s27 = int_to_ptr.vmem [resolvable:$true] %s342_s27 }
  0x4c   : > { %s325_s30 = scalar_lea.hbm %s878_s1, %s494_s26  ;;  %s612_s2 = smov 256  }
  0x4d   : > { %506 = sst [smem:[#allocation9]] (%p677_p9), %s612_s2  ;;  %s613_s3 = smov 512  }
  0x4e   : > { %507 = sst [smem:[#allocation9 + $0x1]] (%p677_p9), %s613_s3  ;;  %s614_s4 = smov 2  }
  0x4f   : > { %508 = sst [smem:[#allocation9 + $0x2]] (%p677_p9), %s614_s4  ;;  %s615_s5 = smov 128  }
  0x50   : > { %509 = sst [smem:[#allocation9 + $0x3]] (%p677_p9), %s615_s5  ;;  %s616_s10 = smov 8  }
  0x51   : > { %510 = sst [smem:[#allocation9 + $0x4]] (%p677_p9), %s615_s5  ;;  %s617_s11 = smov [#allocation8]  }
  0x52   : > { %511 = sst [smem:[#allocation9 + $0x5]] (%p677_p9), %s616_s10  ;;  %s618_s13 = smov 0  }
  0x53   : > { %512 = dma.general (%p677_p9), %s343_s27, 4096, %s325_s30, %s313_s17, %s617_s11, [#allocation9], %s618_s13, 0  }
  0x54 PF: > { %s370_s14 = sand.u32 1, %s591_s6   ;;  %p515_p1 = pnand %p447_p11, %p681_p10 }
  0x55   : > { %s371_s21 = scalar_lea.sflag [#allocation4], %s370_s14 }
  0x56   : > { %586 = dma.done.wait (!%p515_p1), %s371_s21, 4096  }
  0x57   : > { %588 = vsyncadd (!%p515_p1), %s371_s21, 4294963200  ;;  %p14_p2 = scmp.ge.s32.totalorder %s654_s12, 4   ;;  %s883_s6 = smov %s595_s7 }
  0x58   : > { %s884_s7 = smov %s599_s8  ;;  %s885_s8 = smov %s666_s15 }
  0x59   : > { %s886_s9 = smov %s654_s12  ;;  %16 = sbr.rel (!%p14_p2) target bundleno = 5 (0x5), region = 96 }
  0x60   :  { %376 = vsyncpa [#allocation3], 1 }
  0x61   :  { %378 = vsyncpa [#allocation3 + $0x1], 1 }
  0x62   :  { %379 = vsyncpa [#allocation4], 1 }
  0x63   :  { %381 = vsyncpa [#allocation4 + $0x1], 1 }

</bundles_post_ra>
